<compile_context>
chip_gen: v7x
topology: tpu7x:2x2x1
jax: 0.10.0
libtpu: 0.0.40
codegen_flags: <defaults>
</compile_context>

<pallas_src>
import functools

import jax
import jax.numpy as jnp
from jax.experimental import pallas as pl
from jax.experimental.pallas import tpu as pltpu


def value_net_kernel(x_ref, w1_ref, b1_ref, w2_ref, b2_ref, w3_ref, b3_ref, o_ref):
    """Fused 3-layer MLP: relu(x@W1+b1) -> relu(.@W2+b2) -> .@W3 + b3.

    All matmuls run on the MXU with f32 accumulation; operands are cast to the
    weight dtype (bf16 by default) on the VPU.  Bias adds / ReLU stay in f32.
    Shapes are the *folded* ones: x (TBf, F*S), W1 (F*S, F*H), W2 (F*H, F*H),
    W3 (F*H, F), output (TBf, F).
    """
    mxu_dtype = w1_ref.dtype

    x = x_ref[...].astype(mxu_dtype)                                   # (TBf, F*S)

    h1 = jnp.dot(x, w1_ref[...], preferred_element_type=jnp.float32)
    h1 = jnp.maximum(h1 + b1_ref[...], 0.0)                            # f32

    h2 = jnp.dot(h1.astype(mxu_dtype), w2_ref[...],
                 preferred_element_type=jnp.float32)
    h2 = jnp.maximum(h2 + b2_ref[...], 0.0)                            # f32

    out = jnp.dot(h2.astype(mxu_dtype), w3_ref[...],
                  preferred_element_type=jnp.float32)                  # (TBf, F)
    o_ref[...] = (out + b3_ref[0, 0]).astype(o_ref.dtype)              # scalar b3 (SMEM)


def _round_up(x, m):
    return (x + m - 1) // m * m


def _block_diag(w, fold):
    """fold copies of w along the diagonal: (a, b) -> (fold*a, fold*b)."""
    if fold == 1:
        return w
    return jnp.kron(jnp.eye(fold, dtype=w.dtype), w)


def _batch_axis_semantics():
    """'parallel' everywhere; CORE_PARALLEL on v7x so both TensorCores split the
    batch grid (plain 'parallel' vs 'arbitrary' does not change codegen)."""
    core_parallel = getattr(pltpu, "CORE_PARALLEL", None)
    try:
        kind = jax.devices()[0].device_kind.lower()
    except Exception:
        kind = ""
    if core_parallel is not None and ("v7" in kind or "7x" in kind):
        return (core_parallel,)
    return ("parallel",)


@functools.partial(jax.jit, static_argnames=("tile_b", "mxu_dtype"))
def value_network_forward(state, params, *, tile_b=4096, mxu_dtype=jnp.bfloat16):
    """state: (B, state_dim). params: w1 (S,H), b1 (1,H), w2 (H,H), b2 (1,H),
    w3 (H,1), b3 (1,1) [all stored (in, out) for x @ W].  Returns (B, 1) f32."""
    B, S = state.shape
    H = params["w1"].shape[1]
    f32 = jnp.float32

    # Batch-folding factor: pack F consecutive samples into one row so F*S lanes
    # and F*H MXU columns are used instead of S / H.  Exact (hard-zero blocks).
    fold = max(1, min(128 // max(S, 1), 256 // max(H, 1)))

    # Block-diagonal / tiled parameters (tiny; rebuilt per call by XLA).
    w1_bd = _block_diag(params["w1"].astype(f32), fold).astype(mxu_dtype)
    w2_bd = _block_diag(params["w2"].astype(f32), fold).astype(mxu_dtype)
    w3_bd = _block_diag(params["w3"].astype(f32), fold).astype(mxu_dtype)
    b1_bd = jnp.tile(params["b1"].astype(f32), (1, fold))
    b2_bd = jnp.tile(params["b2"].astype(f32), (1, fold))
    b3 = params["b3"].astype(f32).reshape(1, 1)            # 32-bit scalar for SMEM

    # Batch tiling over *folded* rows; tiles are multiples of 16 sublanes so
    # bf16 inputs match the 16-row packed tiling.  Padded rows are sliced off.
    bf = pl.cdiv(B, fold)
    tbf = min(_round_up(max(tile_b // fold, 16), 16), _round_up(bf, 16))
    bf_pad = _round_up(bf, tbf)
    b_pad = bf_pad * fold
    if b_pad != B:
        state = jnp.pad(state, ((0, b_pad - B), (0, 0)))
    x_folded = state.reshape(bf_pad, fold * S)             # same linear HBM order
    num_tiles = bf_pad // tbf

    # Weights/biases: full-array blocks with a constant index_map -> DMA'd once,
    # VMEM-resident across the whole grid.
    def resident(a):
        return pl.BlockSpec(a.shape, lambda i: (0,) * a.ndim)

    # Scoped-VMEM request: double-buffered state/output tiles + resident weights,
    # with headroom (v5e's scoped default is only 16 MiB).
    def vmem_tile_bytes(rows, cols, itemsize):
        return _round_up(rows, 8) * _round_up(cols, 128) * itemsize

    itm_x = jnp.dtype(state.dtype).itemsize
    itm_w = jnp.dtype(mxu_dtype).itemsize
    vmem_est = (2 * vmem_tile_bytes(tbf, fold * S, itm_x)
                + 2 * vmem_tile_bytes(tbf, fold, 4)
                + vmem_tile_bytes(fold * S, fold * H, itm_w)
                + vmem_tile_bytes(fold * H, fold * H, itm_w)
                + vmem_tile_bytes(fold * H, fold, itm_w)
                + 2 * vmem_tile_bytes(1, fold * H, 4))
    vmem_limit = int(min(max(4 * vmem_est, 32 * 1024 * 1024), 48 * 1024 * 1024))

    out = pl.pallas_call(
        value_net_kernel,
        grid=(num_tiles,),
        out_shape=jax.ShapeDtypeStruct((bf_pad, fold), jnp.float32),
        in_specs=[
            pl.BlockSpec((tbf, fold * S), lambda i: (i, 0)),     # folded state tile
            resident(w1_bd), resident(b1_bd),
            resident(w2_bd), resident(b2_bd),
            resident(w3_bd),
            pl.BlockSpec(memory_space=pltpu.MemorySpace.SMEM),   # scalar b3
        ],
        out_specs=pl.BlockSpec((tbf, fold), lambda i: (i, 0)),
        compiler_params=pltpu.CompilerParams(
            dimension_semantics=_batch_axis_semantics(),
            vmem_limit_bytes=vmem_limit,
        ),
    )(x_folded, w1_bd, b1_bd, w2_bd, b2_bd, w3_bd, b3)

    # (bf_pad, fold) row-major has the same linear order as (b_pad, 1).
    return out.reshape(b_pad, 1)[:B]


def init_params(key, state_dim, hidden_dim, init_w=0.003, dtype=jnp.float32):
    """Mirror the PyTorch module: linear1/linear2 use the default
    U(-1/sqrt(fan_in), 1/sqrt(fan_in)) init; linear3 weight/bias use
    U(-init_w, init_w).  Weights stored (in, out) for x @ W on the MXU."""
    ks = jax.random.split(key, 6)
    bound1 = 1.0 / jnp.sqrt(state_dim)
    bound2 = 1.0 / jnp.sqrt(hidden_dim)
    p = {
        "w1": jax.random.uniform(ks[0], (state_dim, hidden_dim), jnp.float32, -bound1, bound1),
        "b1": jax.random.uniform(ks[1], (1, hidden_dim), jnp.float32, -bound1, bound1),
        "w2": jax.random.uniform(ks[2], (hidden_dim, hidden_dim), jnp.float32, -bound2, bound2),
        "b2": jax.random.uniform(ks[3], (1, hidden_dim), jnp.float32, -bound2, bound2),
        "w3": jax.random.uniform(ks[4], (hidden_dim, 1), jnp.float32, -init_w, init_w),
        "b3": jax.random.uniform(ks[5], (1, 1), jnp.float32, -init_w, init_w),
    }
    return {k: v.astype(dtype) for k, v in p.items()}


def reference_forward(state, params, mxu_dtype=jnp.bfloat16):
    """Pure-JAX reference with the same operand precision as the kernel
    (bf16 matmul operands, f32 accumulation, f32 bias/ReLU)."""
    f32 = jnp.float32

    def mm(a, w):
        return jnp.dot(a.astype(mxu_dtype), w.astype(mxu_dtype),
                       preferred_element_type=f32)

    h1 = jnp.maximum(mm(state, params["w1"]) + params["b1"].astype(f32), 0.0)
    h2 = jnp.maximum(mm(h1, params["w2"]) + params["b2"].astype(f32), 0.0)
    return mm(h2, params["w3"]) + params["b3"].astype(f32)


if __name__ == "__main__":
    key = jax.random.PRNGKey(0)
    k_param, k_state = jax.random.split(key)

    batch, state_dim, hidden_dim = 8, 16, 32
    params = init_params(k_param, state_dim, hidden_dim, init_w=0.003)
    state = jax.random.normal(k_state, (batch, state_dim), dtype=jnp.float32)

    # Small batch: fold=8, single (16, 128) folded tile, one grid step.
    out = jax.block_until_ready(value_network_forward(state, params))
    ref = reference_forward(state, params)
    assert out.shape == (batch, 1), out.shape
    assert jnp.allclose(out, ref, atol=2e-3, rtol=2e-2), (out, ref)

    # Batch not a multiple of the tile: exercises grid > 1 and batch padding.
    big_b = 300
    big_state = jax.random.normal(jax.random.PRNGKey(1), (big_b, state_dim), jnp.float32)
    out_big = jax.block_until_ready(value_network_forward(big_state, params, tile_b=256))
    ref_big = reference_forward(big_state, params)
    assert out_big.shape == (big_b, 1), out_big.shape
    assert jnp.allclose(out_big, ref_big, atol=2e-3, rtol=2e-2)

    # bf16 state input (16-sublane packed state tiles, halved state DMA bytes).
    out_bf16 = jax.block_until_ready(
        value_network_forward(state.astype(jnp.bfloat16), params))
    ref_bf16 = reference_forward(state.astype(jnp.bfloat16), params)
    assert out_bf16.shape == (batch, 1)
    assert jnp.allclose(out_bf16, ref_bf16, atol=2e-3, rtol=2e-2)

    print("KERNEL_OK")
</pallas_src>

<mosaic_0001>
module attributes {stable_mosaic.version = 11 : i64} {
  func.func @value_net_kernel(%arg0: i32, %arg1: memref<16x128xf32, #tpu.memory_space<vmem>>, %arg2: memref<128x256xbf16, #tpu.memory_space<vmem>>, %arg3: memref<1x256xf32, #tpu.memory_space<vmem>>, %arg4: memref<256x256xbf16, #tpu.memory_space<vmem>>, %arg5: memref<1x256xf32, #tpu.memory_space<vmem>>, %arg6: memref<256x8xbf16, #tpu.memory_space<vmem>>, %arg7: memref<1x1xf32, #tpu.memory_space<smem>>, %arg8: memref<16x8xf32, #tpu.memory_space<vmem>>) attributes {dimension_semantics = [#tpu.dimension_semantics<parallel>], iteration_bounds = array<i64: 1>, scalar_prefetch = 0 : i64, scratch_operands = 0 : i64, tpu.core_type = #tpu.core_type<tc>, window_params = [{transform_indices = @transform_0, window_bounds = array<i64: 16, 128>}, {pipeline_mode = #tpu.pipeline_mode<synchronous>, transform_indices = @transform_1, window_bounds = array<i64: 128, 256>}, {pipeline_mode = #tpu.pipeline_mode<synchronous>, transform_indices = @transform_2, window_bounds = array<i64: 1, 256>}, {pipeline_mode = #tpu.pipeline_mode<synchronous>, transform_indices = @transform_3, window_bounds = array<i64: 256, 256>}, {pipeline_mode = #tpu.pipeline_mode<synchronous>, transform_indices = @transform_4, window_bounds = array<i64: 1, 256>}, {pipeline_mode = #tpu.pipeline_mode<synchronous>, transform_indices = @transform_5, window_bounds = array<i64: 256, 8>}, {transform_indices = @transform_6, window_bounds = array<i64: 1, 1>}, {transform_indices = @transform_7, window_bounds = array<i64: 16, 8>}]} {
    %c0 = arith.constant 0 : index
    %c0_0 = arith.constant 0 : index
    %0 = vector.load %arg1[%c0, %c0_0] : memref<16x128xf32, #tpu.memory_space<vmem>>, vector<16x128xf32>
    %1 = arith.truncf %0 : vector<16x128xf32> to vector<16x128xbf16>
    %c0_1 = arith.constant 0 : index
    %c0_2 = arith.constant 0 : index
    %2 = vector.load %arg2[%c0_1, %c0_2] : memref<128x256xbf16, #tpu.memory_space<vmem>>, vector<128x256xbf16>
    %cst = arith.constant dense<0.000000e+00> : vector<16x256xf32>
    %3 = tpu.matmul %1, %2, %cst {dimension_numbers = #tpu.dot_dimension_numbers<[1], [0], [0], [1], [0, 0, 1, 1], [], []>} : vector<16x128xbf16>, vector<128x256xbf16>, vector<16x256xf32> -> vector<16x256xf32>
    %c0_3 = arith.constant 0 : index
    %c0_4 = arith.constant 0 : index
    %4 = vector.load %arg3[%c0_3, %c0_4] : memref<1x256xf32, #tpu.memory_space<vmem>>, vector<1x256xf32>
    %5 = vector.broadcast %4 : vector<1x256xf32> to vector<16x256xf32>
    %6 = arith.addf %3, %5 : vector<16x256xf32>
    %cst_5 = arith.constant 0.000000e+00 : f32
    %7 = vector.broadcast %cst_5 : f32 to vector<16x256xf32>
    %8 = arith.maximumf %6, %7 : vector<16x256xf32>
    %9 = arith.truncf %8 : vector<16x256xf32> to vector<16x256xbf16>
    %c0_6 = arith.constant 0 : index
    %c0_7 = arith.constant 0 : index
    %10 = vector.load %arg4[%c0_6, %c0_7] : memref<256x256xbf16, #tpu.memory_space<vmem>>, vector<256x256xbf16>
    %cst_8 = arith.constant dense<0.000000e+00> : vector<16x256xf32>
    %11 = tpu.matmul %9, %10, %cst_8 {dimension_numbers = #tpu.dot_dimension_numbers<[1], [0], [0], [1], [0, 0, 1, 1], [], []>} : vector<16x256xbf16>, vector<256x256xbf16>, vector<16x256xf32> -> vector<16x256xf32>
    %c0_9 = arith.constant 0 : index
    %c0_10 = arith.constant 0 : index
    %12 = vector.load %arg5[%c0_9, %c0_10] : memref<1x256xf32, #tpu.memory_space<vmem>>, vector<1x256xf32>
    %13 = vector.broadcast %12 : vector<1x256xf32> to vector<16x256xf32>
    %14 = arith.addf %11, %13 : vector<16x256xf32>
    %cst_11 = arith.constant 0.000000e+00 : f32
    %15 = vector.broadcast %cst_11 : f32 to vector<16x256xf32>
    %16 = arith.maximumf %14, %15 : vector<16x256xf32>
    %17 = arith.truncf %16 : vector<16x256xf32> to vector<16x256xbf16>
    %c0_12 = arith.constant 0 : index
    %c0_13 = arith.constant 0 : index
    %18 = vector.load %arg6[%c0_12, %c0_13] : memref<256x8xbf16, #tpu.memory_space<vmem>>, vector<256x8xbf16>
    %cst_14 = arith.constant dense<0.000000e+00> : vector<16x8xf32>
    %19 = tpu.matmul %17, %18, %cst_14 {dimension_numbers = #tpu.dot_dimension_numbers<[1], [0], [0], [1], [0, 0, 1, 1], [], []>} : vector<16x256xbf16>, vector<256x8xbf16>, vector<16x8xf32> -> vector<16x8xf32>
    %c0_15 = arith.constant 0 : index
    %c0_16 = arith.constant 0 : index
    %20 = memref.load %arg7[%c0_15, %c0_16] : memref<1x1xf32, #tpu.memory_space<smem>>
    %21 = vector.broadcast %20 : f32 to vector<16x8xf32>
    %22 = arith.addf %19, %21 : vector<16x8xf32>
    %c0_17 = arith.constant 0 : index
    %c0_18 = arith.constant 0 : index
    %23 = vector.load %arg8[%c0_17, %c0_18] : memref<16x8xf32, #tpu.memory_space<vmem>>, vector<16x8xf32>
    tpu.vector_store %arg8[%c0_17, %c0_18], %22 {strides = array<i32>} : memref<16x8xf32, #tpu.memory_space<vmem>>, vector<16x8xf32>,
    return
  }
  func.func @transform_0(%arg0: i32) -> (i32, i32) {
    %c0_i32 = arith.constant 0 : i32
    %c0_i32_0 = arith.constant 0 : i32
    return %arg0, %c0_i32 : i32, i32
  }
  func.func @transform_1(%arg0: i32) -> (i32, i32) {
    %c0_i32 = arith.constant 0 : i32
    %c0_i32_0 = arith.constant 0 : i32
    %c0_i32_1 = arith.constant 0 : i32
    return %c0_i32, %c0_i32_0 : i32, i32
  }
  func.func @transform_2(%arg0: i32) -> (i32, i32) {
    %c0_i32 = arith.constant 0 : i32
    %c0_i32_0 = arith.constant 0 : i32
    %c0_i32_1 = arith.constant 0 : i32
    return %c0_i32, %c0_i32_0 : i32, i32
  }
  func.func @transform_3(%arg0: i32) -> (i32, i32) {
    %c0_i32 = arith.constant 0 : i32
    %c0_i32_0 = arith.constant 0 : i32
    %c0_i32_1 = arith.constant 0 : i32
    return %c0_i32, %c0_i32_0 : i32, i32
  }
  func.func @transform_4(%arg0: i32) -> (i32, i32) {
    %c0_i32 = arith.constant 0 : i32
    %c0_i32_0 = arith.constant 0 : i32
    %c0_i32_1 = arith.constant 0 : i32
    return %c0_i32, %c0_i32_0 : i32, i32
  }
  func.func @transform_5(%arg0: i32) -> (i32, i32) {
    %c0_i32 = arith.constant 0 : i32
    %c0_i32_0 = arith.constant 0 : i32
    %c0_i32_1 = arith.constant 0 : i32
    return %c0_i32, %c0_i32_0 : i32, i32
  }
  func.func @transform_6(%arg0: i32) -> (i32, i32) {
    %c0_i32 = arith.constant 0 : i32
    %c0_i32_0 = arith.constant 0 : i32
    %c0_i32_1 = arith.constant 0 : i32
    return %c0_i32, %c0_i32_0 : i32, i32
  }
  func.func @transform_7(%arg0: i32) -> (i32, i32) {
    %c0_i32 = arith.constant 0 : i32
    %c0_i32_0 = arith.constant 0 : i32
    return %arg0, %c0_i32 : i32, i32
  }
}

</mosaic_0001>

<bundles_post_ra>
// kernel: value_network_forward.1
= control target key start
LH: loop header
LB: loop body
LE: loop exit
PB: predicated region body
PF: predicated region fallthrough
CT: control target
= control target key end

     0   :  { %v794_v1 = vmov 0   ;;  %v49_v63 = vlaneseq  ;;  %vm612_vm0 = vcmask 64512   ;;  %s1048_s1 = inlined_call_operand.vmem [shape: bf16[128,256], index: 1, kind: input, shape index: {}]   ;;  %s1049_s3 = inlined_call_operand.vmem [shape: bf16[256,256], index: 3, kind: input, shape index: {}]   ;;  %s1050_s0 = inlined_call_operand.vmem [shape: f32[16,128], index: 0, kind: input, shape index: {}]   ;;  %s1051_s5 = inlined_call_operand.vmem [shape: bf16[256,8], index: 5, kind: input, shape index: {}]   ;;  %s1052_s2 = inlined_call_operand.vmem [shape: f32[1,256], index: 2, kind: input, shape index: {}]   ;;  %s1053_s4 = inlined_call_operand.vmem [shape: f32[1,256], index: 4, kind: input, shape index: {}]   ;;  %s1054_s6 = inlined_call_operand.<no memory space> [shape: f32[1,1], index: 6, kind: input, shape index: {}]   ;;  %s1055_s7 = inlined_call_operand.vmem [shape: f32[16,8], index: 7, kind: output, shape index: {}]  }
   0x1   :  { %v706_v0 = vld [vmem:[%s1048_s1 + $0x4] ss:$8 sps:$4 sm:$0xff]   ;;  %171 = vmatprep.mubr.bf16.mxu0 %v794_v1  ;;  %v708_v2 = vld [vmem:[%s1048_s1] ss:$8 sps:$4 sm:$0xff]   ;;  %v709_v3 = vld [vmem:[%s1048_s1 + $0x14] ss:$8 sps:$4 sm:$0xff]  }
   0x2   :  { %139 = vmatprep.subr.bf16.mxu0 %v706_v0  ;;  %v711_v4 = vld [vmem:[%s1048_s1 + $0x10] ss:$8 sps:$4 sm:$0xff]   ;;  %v712_v5 = vld [vmem:[%s1048_s1 + $0x24] ss:$8 sps:$4 sm:$0xff]   ;;  %v714_v6 = vld [vmem:[%s1048_s1 + $0x20] ss:$8 sps:$4 sm:$0xff]  }
   0x3   :  { %140 = vmatpush1.bf16.msra.mxu0 %v708_v2  ;;  %v715_v7 = vld [vmem:[%s1048_s1 + $0x34] ss:$8 sps:$4 sm:$0xff]   ;;  %v717_v8 = vld [vmem:[%s1048_s1 + $0x30] ss:$8 sps:$4 sm:$0xff]   ;;  %v718_v9 = vld [vmem:[%s1048_s1 + $0x44] ss:$8 sps:$4 sm:$0xff]  }
   0x4   :  { %141 = vmatprep.subr.bf16.mxu0 %v709_v3  ;;  %v730_v10 = vld [vmem:[%s1049_s3 + $0x4] ss:$8 sps:$4 sm:$0xff]   ;;  %v732_v11 = vld [vmem:[%s1049_s3] ss:$8 sps:$4 sm:$0xff]   ;;  %v733_v12 = vld [vmem:[%s1049_s3 + $0x14] ss:$8 sps:$4 sm:$0xff]  }
   0x5   :  { %v720_v13 = vld [vmem:[%s1048_s1 + $0x40] ss:$8 sps:$4 sm:$0xff]   ;;  %392 = vmatprep.subr.bf16.mxu1 %v730_v10  ;;  %v735_v14 = vld [vmem:[%s1049_s3 + $0x10] ss:$8 sps:$4 sm:$0xff]   ;;  %v721_v15 = vld [vmem:[%s1048_s1 + $0x54] ss:$8 sps:$4 sm:$0xff]  }
   0x6   :  { %393 = vmatpush1.bf16.msra.mxu1 %v732_v11  ;;  %v736_v16 = vld [vmem:[%s1049_s3 + $0x24] ss:$8 sps:$4 sm:$0xff]   ;;  %v723_v17 = vld [vmem:[%s1048_s1 + $0x50] ss:$8 sps:$4 sm:$0xff]   ;;  %v738_v18 = vld [vmem:[%s1049_s3 + $0x20] ss:$8 sps:$4 sm:$0xff]  }
   0x7   :  { %142 = vmatpush1.bf16.msra.mxu0 %v711_v4  ;;  %394 = vmatprep.subr.bf16.mxu1 %v733_v12  ;;  %v724_v19 = vld [vmem:[%s1048_s1 + $0x64] ss:$8 sps:$4 sm:$0xff]   ;;  %v739_v20 = vld [vmem:[%s1049_s3 + $0x34] ss:$8 sps:$4 sm:$0xff]   ;;  %v726_v21 = vld [vmem:[%s1048_s1 + $0x60] ss:$8 sps:$4 sm:$0xff]  }
   0x8   :  { %143 = vmatprep.subr.bf16.mxu0 %v712_v5  ;;  %v741_v22 = vld [vmem:[%s1049_s3 + $0x30] ss:$8 sps:$4 sm:$0xff]   ;;  %v727_v23 = vld [vmem:[%s1048_s1 + $0x74] ss:$8 sps:$4 sm:$0xff]   ;;  %v742_v24 = vld [vmem:[%s1049_s3 + $0x44] ss:$8 sps:$4 sm:$0xff]  }
   0x9   :  { %v729_v25 = vld [vmem:[%s1048_s1 + $0x70] ss:$8 sps:$4 sm:$0xff]   ;;  %v28_v26 = vld [vmem:[%s1050_s0] sm:$0xff]  ;;  %v29_v27 = vld [vmem:[%s1050_s0 + $0x8] sm:$0xff]  ;;  %v50_v0 = vshrl.u32 %v49_v63, 7 }
   0xa   :  { %395 = vmatpush1.bf16.msra.mxu1 %v735_v14  ;;  %v744_v28 = vld [vmem:[%s1049_s3 + $0x40] ss:$8 sps:$4 sm:$0xff]   ;;  %v745_v29 = vld [vmem:[%s1049_s3 + $0x54] ss:$8 sps:$4 sm:$0xff]   ;;  %v30_v30 = vpack.c.bf16 %v29_v27, %v28_v26  ;;  %v747_v31 = vld [vmem:[%s1049_s3 + $0x50] ss:$8 sps:$4 sm:$0xff]  }
   0xb   :  { %144 = vmatpush1.bf16.msra.mxu0 %v714_v6  ;;  %396 = vmatprep.subr.bf16.mxu1 %v736_v16  ;;  %v748_v32 = vld [vmem:[%s1049_s3 + $0x64] ss:$8 sps:$4 sm:$0xff]   ;;  %v750_v33 = vld [vmem:[%s1049_s3 + $0x60] ss:$8 sps:$4 sm:$0xff]   ;;  %v751_v34 = vld [vmem:[%s1049_s3 + $0x74] ss:$8 sps:$4 sm:$0xff]  }
   0xc   :  { %145 = vmatprep.subr.bf16.mxu0 %v715_v7  ;;  %v753_v35 = vld [vmem:[%s1049_s3 + $0x70] ss:$8 sps:$4 sm:$0xff]   ;;  %v754_v36 = vld [vmem:[%s1049_s3 + $0x84] ss:$8 sps:$4 sm:$0xff]   ;;  %v756_v37 = vld [vmem:[%s1049_s3 + $0x80] ss:$8 sps:$4 sm:$0xff]  }
   0xd   :  { %v757_v38 = vld [vmem:[%s1049_s3 + $0x94] ss:$8 sps:$4 sm:$0xff]   ;;  %v759_v39 = vld [vmem:[%s1049_s3 + $0x90] ss:$8 sps:$4 sm:$0xff]   ;;  %v760_v40 = vld [vmem:[%s1049_s3 + $0xa4] ss:$8 sps:$4 sm:$0xff]  }
   0xe   :  { %397 = vmatpush1.bf16.msra.mxu1 %v738_v18  ;;  %v762_v41 = vld [vmem:[%s1049_s3 + $0xa0] ss:$8 sps:$4 sm:$0xff]   ;;  %v763_v42 = vld [vmem:[%s1049_s3 + $0xb4] ss:$8 sps:$4 sm:$0xff]   ;;  %v765_v43 = vld [vmem:[%s1049_s3 + $0xb0] ss:$8 sps:$4 sm:$0xff]  }
   0xf   :  { %146 = vmatpush1.bf16.msra.mxu0 %v717_v8  ;;  %398 = vmatprep.subr.bf16.mxu1 %v739_v20  ;;  %v766_v44 = vld [vmem:[%s1049_s3 + $0xc4] ss:$8 sps:$4 sm:$0xff]   ;;  %v768_v45 = vld [vmem:[%s1049_s3 + $0xc0] ss:$8 sps:$4 sm:$0xff]   ;;  %v769_v46 = vld [vmem:[%s1049_s3 + $0xd4] ss:$8 sps:$4 sm:$0xff]  }
  0x10   :  { %147 = vmatprep.subr.bf16.mxu0 %v718_v9  ;;  %v771_v47 = vld [vmem:[%s1049_s3 + $0xd0] ss:$8 sps:$4 sm:$0xff]   ;;  %v772_v48 = vld [vmem:[%s1049_s3 + $0xe4] ss:$8 sps:$4 sm:$0xff]   ;;  %v774_v49 = vld [vmem:[%s1049_s3 + $0xe0] ss:$8 sps:$4 sm:$0xff]  }
  0x11   :  { %v775_v50 = vld [vmem:[%s1049_s3 + $0xf4] ss:$8 sps:$4 sm:$0xff]   ;;  %v777_v51 = vld [vmem:[%s1049_s3 + $0xf0] ss:$8 sps:$4 sm:$0xff]   ;;  %v778_v52 = vld [vmem:[%s1051_s5 + $0x40] sm:$0xff]   ;;  %v51_v1 = vsub.s32 0, %v50_v0 }
  0x12   :  { %399 = vmatpush1.bf16.msra.mxu1 %v741_v22  ;;  %v779_v53 = vld [vmem:[%s1051_s5] sm:$0xff]   ;;  %v780_v54 = vld [vmem:[%s1051_s5 + $0x48] sm:$0xff]   ;;  %v782_v56 = vld [vmem:[%s1051_s5 + $0x50] sm:$0xff]   ;;  %v55_v3 = vsub.s32 1, %v50_v0 }
  0x13   :  { %148 = vmatpush1.bf16.msra.mxu0 %v720_v13  ;;  %400 = vmatprep.subr.bf16.mxu1 %v742_v24  ;;  %v781_v55 = vld [vmem:[%s1051_s5 + $0x8] sm:$0xff]   ;;  %v783_v57 = vld [vmem:[%s1051_s5 + $0x10] sm:$0xff]   ;;  %v784_v58 = vld [vmem:[%s1051_s5 + $0x58] sm:$0xff]  }
  0x14   :  { %149 = vmatprep.subr.bf16.mxu0 %v721_v15  ;;  %v785_v59 = vld [vmem:[%s1051_s5 + $0x18] sm:$0xff]   ;;  %v786_v60 = vld [vmem:[%s1051_s5 + $0x60] sm:$0xff]   ;;  %v788_v62 = vld [vmem:[%s1051_s5 + $0x68] sm:$0xff]  }
  0x15   :  { %v787_v61 = vld [vmem:[%s1051_s5 + $0x20] sm:$0xff]   ;;  %v789_v20 = vld [vmem:[%s1051_s5 + $0x28] sm:$0xff]   ;;  %v791_v22 = vld [vmem:[%s1051_s5 + $0x30] sm:$0xff]  }
  0x16   :  { %401 = vmatpush1.bf16.msra.mxu1 %v744_v28  ;;  %v47_v2 = vld [vmem:[%s1052_s2] sm:$0x3]  ;;  %v793_v24 = vld [vmem:[%s1051_s5 + $0x38] sm:$0xff]  }
  0x17   :  { %150 = vmatpush1.bf16.msra.mxu0 %v723_v17  ;;  %402 = vmatprep.subr.bf16.mxu1 %v745_v29  ;;  %v52_v4 = vrot.slane %v47_v2, %v51_v1  ;;  %v56_v5 = vrot.slane %v47_v2, %v55_v3 }
  0x18   :  { %151 = vmatprep.subr.bf16.mxu0 %v724_v19 }
  0x1a   :  { %403 = vmatpush1.bf16.msra.mxu1 %v747_v31 }
  0x1b   :  { %152 = vmatpush1.bf16.msra.mxu0 %v726_v21  ;;  %404 = vmatprep.subr.bf16.mxu1 %v748_v32  ;;  %v790_v21 = vld [vmem:[%s1051_s5 + $0x70] sm:$0xff]  }
  0x1c   :  { %153 = vmatprep.subr.bf16.mxu0 %v727_v23  ;;  %v792_v23 = vld [vmem:[%s1051_s5 + $0x78] sm:$0xff]  }
  0x1e   :  { %405 = vmatpush1.bf16.msra.mxu1 %v750_v33 }
  0x1f   :  { %154 = vmatpush1.bf16.msra.mxu0 %v729_v25  ;;  %406 = vmatprep.subr.bf16.mxu1 %v751_v34  ;;  %v220_v25 = vld [vmem:[%s1053_s4] sm:$0x3] }
  0x20   :  { %683 = vmatprep.subr.bf16.mxu0 %v778_v52  ;;  %v225_v26 = vrot.slane %v220_v25, %v51_v1  ;;  %v229_v27 = vrot.slane %v220_v25, %v55_v3 }
  0x22   :  { %172 = vmatmul.mubr.bf16.vlgmr.msra.gmra.mrb[0].mxu0 %v30_v30  ;;  %407 = vmatpush1.bf16.msra.mxu1 %v753_v35 }
  0x23   :  { %408 = vmatprep.subr.bf16.mxu1 %v754_v36  ;;  %684 = vmatpush3.bf16.msra.mxu0 %v779_v53 }
  0x24   :  { %685 = vmatprep.subr.bf16.mxu0 %v780_v54 }
  0x26   :  { %409 = vmatpush1.bf16.msra.mxu1 %v756_v37 }
  0x27   :  { %410 = vmatprep.subr.bf16.mxu1 %v757_v38  ;;  %686 = vmatpush3.bf16.msra.mxu0 %v781_v55 }
  0x28   :  { %687 = vmatprep.subr.bf16.mxu0 %v782_v56 }
  0x2a   :  { %411 = vmatpush1.bf16.msra.mxu1 %v759_v39 }
  0x2b   :  { %412 = vmatprep.subr.bf16.mxu1 %v760_v40  ;;  %688 = vmatpush3.bf16.msra.mxu0 %v783_v57 }
  0x2c   :  { %689 = vmatprep.subr.bf16.mxu0 %v784_v58 }
  0x2e   :  { %413 = vmatpush1.bf16.msra.mxu1 %v762_v41 }
  0x2f   :  { %414 = vmatprep.subr.bf16.mxu1 %v763_v42  ;;  %690 = vmatpush3.bf16.msra.mxu0 %v785_v59 }
  0x30   :  { %691 = vmatprep.subr.bf16.mxu0 %v786_v60 }
  0x32   :  { %415 = vmatpush1.bf16.msra.mxu1 %v765_v43  ;;  %v474_v43 = vstv %s1054_s6 }
  0x33   :  { %416 = vmatprep.subr.bf16.mxu1 %v766_v44  ;;  %692 = vmatpush3.bf16.msra.mxu0 %v787_v61 }
  0x34   :  { %693 = vmatprep.subr.bf16.mxu0 %v788_v62 }
  0x36   :  { %417 = vmatpush1.bf16.msra.mxu1 %v768_v45 }
  0x37   :  { %418 = vmatprep.subr.bf16.mxu1 %v769_v46  ;;  %694 = vmatpush3.bf16.msra.mxu0 %v789_v20 }
  0x38   :  { %695 = vmatprep.subr.bf16.mxu0 %v790_v21 }
  0x3a   :  { %419 = vmatpush1.bf16.msra.mxu1 %v771_v47 }
  0x3b   :  { %420 = vmatprep.subr.bf16.mxu1 %v772_v48  ;;  %696 = vmatpush3.bf16.msra.mxu0 %v791_v22 }
  0x3c   :  { %697 = vmatprep.subr.bf16.mxu0 %v792_v23 }
  0x3e   :  { %421 = vmatpush1.bf16.msra.mxu1 %v774_v49 }
  0x3f   :  { %422 = vmatprep.subr.bf16.mxu1 %v775_v50  ;;  %698 = vmatpush3.bf16.msra.mxu0 %v793_v24 }
  0x42   :  { %423 = vmatpush1.bf16.msra.mxu1 %v777_v51 }
  0xf5   :  { %v173_v6 = vpop.f32.mrb[0].mxu0 }
  0xf6   :  { %v174_v7 = vadd.f32 %v173_v6, %v52_v4  ;;  %v175_v8 = vpop.f32.mrb[1].mxu0 }
  0xf7   :  { %v176_v9 = vadd.f32 %v175_v8, %v56_v5  ;;  %v177_v10 = vpop.f32.mrb[2].mxu0 }
  0xf8   :  { %v178_v11 = vadd.f32 %v177_v10, %v52_v4  ;;  %v179_v12 = vpop.f32.mrb[3].mxu0  ;;  %v182_v14 = vmax.f32 %v174_v7, 0.0 }
  0xf9   :  { %v180_v13 = vadd.f32 %v179_v12, %v56_v5  ;;  %v183_v16 = vmax.f32 %v176_v9, 0.0 }
  0xfa   :  { %v184_v15 = vmax.f32 %v178_v11, 0.0 }
  0xfb   :  { %v185_v17 = vmax.f32 %v180_v13, 0.0 }
  0xfc   :  { %v186_v18 = vpack.c.bf16 %v184_v15, %v182_v14 }
  0xfd   :  { %v187_v19 = vpack.c.bf16 %v185_v17, %v183_v16 }
  0xff   :  { %424 = vmatprep.mubr.bf16.mxu1 %v187_v19 }
 0x100   :  { %425 = vmatmul.mubr.bf16.vlgmr.msra.gmra.mrb[0].mxu1 %v186_v18 }
 0x1d3   :  { %v426_v28 = vpop.f32.mrb[0].mxu1 }
 0x1d4   :  { %v427_v29 = vadd.f32 %v426_v28, %v225_v26  ;;  %v428_v30 = vpop.f32.mrb[1].mxu1 }
 0x1d5   :  { %v429_v31 = vadd.f32 %v428_v30, %v229_v27  ;;  %v430_v32 = vpop.f32.mrb[2].mxu1 }
 0x1d6   :  { %v431_v33 = vadd.f32 %v430_v32, %v225_v26  ;;  %v432_v34 = vpop.f32.mrb[3].mxu1  ;;  %v435_v36 = vmax.f32 %v427_v29, 0.0 }
 0x1d7   :  { %v433_v35 = vadd.f32 %v432_v34, %v229_v27  ;;  %v436_v38 = vmax.f32 %v429_v31, 0.0 }
 0x1d8   :  { %v437_v37 = vmax.f32 %v431_v33, 0.0 }
 0x1d9   :  { %v438_v39 = vmax.f32 %v433_v35, 0.0 }
 0x1da   :  { %v439_v40 = vpack.c.bf16 %v437_v37, %v435_v36 }
 0x1db   :  { %v440_v41 = vpack.c.bf16 %v438_v39, %v436_v38 }
 0x1dd   :  { %603 = vmatprep.mubr.bf16.mxu0 %v440_v41 }
 0x1de   :  { %604 = vmatmul.mubr.bf16.vlgmr.msra.gmra.mrb[4].mxu0 %v439_v40 }
 0x2b1   :  { %v699_v42 = vpop.f32.mrb[4].mxu0 }
 0x2b2   :  { %v700_v44 = vpop.f32.mrb[5].mxu0 }
 0x2b3   :  { %v701_v45 = vadd.f32 %v700_v44, %v699_v42  ;;  %v702_v46 = vpop.f32.mrb[6].mxu0 }
 0x2b4   :  { %v703_v47 = vpop.f32.mrb[7].mxu0 }
 0x2b5   :  { %v606_v48 = vadd.f32 %v701_v45, %v474_v43  ;;  %v704_v49 = vadd.f32 %v703_v47, %v702_v46 }
 0x2b7   :  { %613 = vst.msk [vmem:[%s1055_s7] sm:$0xff] %vm612_vm0, %v606_v48  ;;  %v609_v50 = vadd.f32 %v704_v49, %v474_v43 }
 0x2b9   :  { %614 = vst.msk [vmem:[%s1055_s7 + $0x8] sm:$0xff] %vm612_vm0, %v609_v50 }

</bundles_post_ra>
